<compile_context>
chip_gen: v7x
topology: tpu7x:2x2x1
jax: 0.10.0
libtpu: 0.0.40
codegen_flags: <defaults>
</compile_context>

<pallas_src>
import jax
import jax.numpy as jnp
from jax.experimental import pallas as pl
from jax.experimental.pallas import tpu as pltpu


def _fused_linear_double_stack_kernel(x_ref, wtr_ref, br_ref, o_ref):
    # x_ref:   (B, IN)
    # wtr_ref: (IN, 2*OUT)  = repeat(weight.T, 2, axis=1)   (prepped once)
    # br_ref:  (1, 2*OUT)   = repeat(bias, 2)[None, :]      (prepped once)
    # o_ref:   (B, 2*OUT)   -> reshaped (metadata-only) to (B, OUT, 2) outside.
    x = x_ref[...].astype(jnp.float32)
    wt = wtr_ref[...].astype(jnp.float32)
    b = br_ref[...].astype(jnp.float32)
    in_features = wt.shape[0]

    # VPU-only contraction: y = sum_i outer(x[:, i], wt[i, :]).
    # Each term: lane-broadcast (B,1) * sublane-broadcast (1,2*OUT) -> (B,2*OUT).
    y = x[:, 0:1] * wt[0:1, :]
    for i in range(1, in_features):  # IN=2 -> single unrolled extra term
        y = y + x[:, i:i + 1] * wt[i:i + 1, :]

    # Fused epilogue: bias add + the (x + x) doubling in one multiply.
    # Columns are already interleaved to match torch.stack((y, y), dim=2).
    o_ref[...] = ((y + b) * jnp.float32(2.0)).astype(o_ref.dtype)


def prepare_params(weight, bias):
    """One-time parameter prep (outside the per-call forward).

    weight: (OUT, IN) torch-style Linear weight
    bias:   (OUT,)
    Returns column-interleaved, pre-transposed params so the kernel's single
    store is already in the final stacked layout.
    """
    wt_rep = jnp.repeat(weight.T, 2, axis=1)       # (IN, 2*OUT)
    b_rep = jnp.repeat(bias, 2)[None, :]           # (1, 2*OUT)
    return wt_rep, b_rep


@jax.jit
def model_forward(x, wt_rep, b_rep):
    B, in_features = x.shape
    two_out = wt_rep.shape[1]
    out_features = two_out // 2
    itemsize = jnp.dtype(x.dtype).itemsize

    out_flat = pl.pallas_call(
        _fused_linear_double_stack_kernel,
        out_shape=jax.ShapeDtypeStruct((B, two_out), x.dtype),
        in_specs=[
            pl.BlockSpec(memory_space=pltpu.VMEM),
            pl.BlockSpec(memory_space=pltpu.VMEM),
            pl.BlockSpec(memory_space=pltpu.VMEM),
        ],
        out_specs=pl.BlockSpec(memory_space=pltpu.VMEM),
        cost_estimate=pl.CostEstimate(
            flops=2 * B * two_out * in_features + 2 * B * two_out,
            transcendentals=0,
            bytes_accessed=(x.size + wt_rep.size + b_rep.size
                            + B * two_out) * itemsize,
        ),
    )(x, wt_rep, b_rep)

    # (B, 2*OUT) -> (B, OUT, 2): metadata-only reshape, folds under jit.
    return out_flat.reshape(B, out_features, 2)


if __name__ == "__main__":
    key = jax.random.PRNGKey(0)
    kx, kw, kb = jax.random.split(key, 3)

    # Shapes implied by the module: Linear(2, 2), input (2, 2)
    x = jax.random.normal(kx, (2, 2), dtype=jnp.float32)
    bound = 1.0 / jnp.sqrt(2.0)  # PyTorch-style uniform bound = 1/sqrt(in_features)
    weight = jax.random.uniform(kw, (2, 2), jnp.float32, -bound, bound)
    bias = jax.random.uniform(kb, (2,), jnp.float32, -bound, bound)

    # One-time parameter prep (persistent, not per-forward).
    wt_rep, b_rep = prepare_params(weight, bias)

    out = jax.block_until_ready(model_forward(x, wt_rep, b_rep))

    # reference check in plain JAX
    ref = x @ weight.T + bias
    ref = ref + ref
    ref = jnp.stack((ref, ref), axis=2)
    assert out.shape == (2, 2, 2), out.shape
    assert jnp.allclose(out, ref, atol=1e-5), "mismatch vs reference"

    print("KERNEL_OK")
</pallas_src>

<mosaic_0001>
module attributes {stable_mosaic.version = 11 : i64} {
  func.func @_fused_linear_double_stack_kernel(%arg0: memref<2x2xf32, #tpu.memory_space<vmem>>, %arg1: memref<2x4xf32, #tpu.memory_space<vmem>>, %arg2: memref<1x4xf32, #tpu.memory_space<vmem>>, %arg3: memref<2x4xf32, #tpu.memory_space<vmem>>) attributes {dimension_semantics = [], scalar_prefetch = 0 : i64, scratch_operands = 0 : i64, tpu.core_type = #tpu.core_type<tc>} {
    %c0 = arith.constant 0 : index
    %c0_0 = arith.constant 0 : index
    %0 = vector.load %arg0[%c0, %c0_0] : memref<2x2xf32, #tpu.memory_space<vmem>>, vector<2x2xf32>
    %c0_1 = arith.constant 0 : index
    %c0_2 = arith.constant 0 : index
    %1 = vector.load %arg1[%c0_1, %c0_2] : memref<2x4xf32, #tpu.memory_space<vmem>>, vector<2x4xf32>
    %c0_3 = arith.constant 0 : index
    %c0_4 = arith.constant 0 : index
    %2 = vector.load %arg2[%c0_3, %c0_4] : memref<1x4xf32, #tpu.memory_space<vmem>>, vector<1x4xf32>
    %3 = vector.extract_strided_slice %0 {offsets = [0, 0], sizes = [2, 1], strides = [1, 1]} : vector<2x2xf32> to vector<2x1xf32>
    %4 = vector.extract_strided_slice %1 {offsets = [0, 0], sizes = [1, 4], strides = [1, 1]} : vector<2x4xf32> to vector<1x4xf32>
    %5 = vector.broadcast %3 : vector<2x1xf32> to vector<2x4xf32>
    %6 = vector.broadcast %4 : vector<1x4xf32> to vector<2x4xf32>
    %7 = arith.mulf %5, %6 : vector<2x4xf32>
    %8 = vector.extract_strided_slice %0 {offsets = [0, 1], sizes = [2, 1], strides = [1, 1]} : vector<2x2xf32> to vector<2x1xf32>
    %9 = vector.extract_strided_slice %1 {offsets = [1, 0], sizes = [1, 4], strides = [1, 1]} : vector<2x4xf32> to vector<1x4xf32>
    %10 = vector.broadcast %8 : vector<2x1xf32> to vector<2x4xf32>
    %11 = vector.broadcast %9 : vector<1x4xf32> to vector<2x4xf32>
    %12 = arith.mulf %10, %11 : vector<2x4xf32>
    %13 = arith.addf %7, %12 : vector<2x4xf32>
    %14 = vector.broadcast %2 : vector<1x4xf32> to vector<2x4xf32>
    %15 = arith.addf %13, %14 : vector<2x4xf32>
    %cst = arith.constant 2.000000e+00 : f32
    %16 = vector.broadcast %cst : f32 to vector<2x4xf32>
    %17 = arith.mulf %15, %16 : vector<2x4xf32>
    %c0_5 = arith.constant 0 : index
    %c0_6 = arith.constant 0 : index
    %18 = vector.load %arg3[%c0_5, %c0_6] : memref<2x4xf32, #tpu.memory_space<vmem>>, vector<2x4xf32>
    tpu.vector_store %arg3[%c0_5, %c0_6], %17 {strides = array<i32>} : memref<2x4xf32, #tpu.memory_space<vmem>>, vector<2x4xf32>,
    return
  }
}

</mosaic_0001>

<bundles_post_ra>
// kernel: model_forward.1
= control target key start
LH: loop header
LB: loop body
LE: loop exit
PB: predicated region body
PF: predicated region fallthrough
CT: control target
= control target key end

     0   :  { %8 = vsyncpa [#allocation3], 0  ;;  %s94_s12 = smov [#allocation2]   ;;  %s138_s0 = inlined_call_operand.hbm [shape: f32[2,2], index: 0, kind: input, shape index: {}]   ;;  %s139_s1 = inlined_call_operand.vmem [shape: f32[2,4], index: 1, kind: input, shape index: {}]   ;;  %s140_s2 = inlined_call_operand.vmem [shape: f32[1,4], index: 2, kind: input, shape index: {}]   ;;  %s141_s3 = inlined_call_operand.vmem [shape: f32[2,4], index: 3, kind: output, shape index: {}]  }
   0x1   :  { %s15_s13 = sshll.u32 %s94_s12, 4  ;;  %s70_s16 = scalar_lea.hbm %s138_s0, 32  ;;  %s16_s13 = int_to_ptr.vmem [resolvable:$true] %s15_s13 }
   0x2   :  { %p71_p0 = scmp.ne.s32.totalorder %s138_s0, %s70_s16  ;;  %p74_p1 = scmp.lt.u32.totalorder %s70_s16, %s138_s0 }
   0x4   :  { %p76_p2 = pnand %p74_p1, %p71_p0 }
   0x6   :  { %79 = shalt.err (!%p76_p2)
}
   0x7   :  { %s80_s21 = scalar_lea.vmem %s16_s13, 32  ;;  %p85_p4 = scmp.lt.s32.totalorder %s16_s13, %s16_s13 }
   0x8   :  { %p81_p3 = scmp.ne.s32.totalorder %s16_s13, %s80_s21  ;;  %p86_p5 = scmp.lt.s32.totalorder %s80_s21, %s80_s21 }
   0xa   :  { %p87_p6 = por %p86_p5, %p85_p4 }
   0xc   :  { %p88_p7 = pnand %p87_p6, %p81_p3 }
   0xe   :  { %91 = shalt.err (!%p88_p7)
}
   0xf   :  { %18 = dma.hbm_to_vmem [thread:$0]  %s138_s0, 32, %s16_s13, [#allocation3]  }
  0x10   :  { %92 = dma.done.wait [#allocation3], 32  }
  0x11   :  { %93 = vsyncadd [#allocation3], 4294967264  ;;  %v95_v0 = vmov 0   ;;  %v26_v1 = vld [vmem:[#allocation2] sm:$0x3]  ;;  %v96_v2 = vmov 1   ;;  %v34_v3 = vlaneseq }
  0x12   :  { %68 = vset.pattern.permute.xlu0 %v95_v0  ;;  %v27_v7 = vld [vmem:[%s139_s1] sm:$0x3]  ;;  %vm57_vm0 = vcmask 25600  }
  0x13   :  { %31 = vperm.xlu0 %68, %v26_v1   ;;  %v35_v4 = vshrl.u32 %v34_v3, 7  ;;  %v64_v14 = vld [vmem:[%s140_s2] ss:$0 sm:$0xff] }
  0x15   :  { %v36_v5 = vsub.s32 0, %v35_v4  ;;  %v45_v6 = vsub.s32 1, %v35_v4 }
  0x17   :  { %69 = vset.pattern.permute.xlu0 %v96_v2  ;;  %v37_v9 = vrot.slane %v27_v7, %v36_v5  ;;  %v46_v10 = vrot.slane %v27_v7, %v45_v6 }
  0x18   :  { %40 = vperm.xlu0 %69, %v26_v1  }
  0x92   :  { %v32_v8 = vpop.permute.xlu0 %31 }
  0x93   :  { %v38_v12 = vmul.f32 %v37_v9, %v32_v8 }
  0x97   :  { %v41_v11 = vpop.permute.xlu0 %40 }
  0x98   :  { %v47_v13 = vmul.f32 %v46_v10, %v41_v11 }
  0x9a   :  { %v48_v15 = vadd.f32 %v47_v13, %v38_v12 }
  0x9c   :  { %v55_v16 = vadd.f32 %v64_v14, %v48_v15 }
  0x9e   :  { %v56_v17 = vmul.f32 2.0, %v55_v16 }
  0xa0   :  { %58 = vst.msk [vmem:[%s141_s3] sm:$0x3] %vm57_vm0, %v56_v17 }
  0xa1   :  { %63 = vsyncpa [#allocation3], 1 }

</bundles_post_ra>
